<compile_context>
chip_gen: v7x
topology: tpu7x:2x2x1
jax: 0.10.0
libtpu: 0.0.40
codegen_flags: <defaults>
</compile_context>

<pallas_src>
import functools

import jax
import jax.numpy as jnp
import numpy as np
from jax import lax
from jax.experimental import pallas as pl
from jax.experimental.pallas import tpu as pltpu

NUM_NODES = 16
NUM_CLUSTERS = 4
NUM_SLEPIANS = 8
IN_CHANNELS = 4
HIDDEN_DIM = 32
OUT_CHANNELS = 6

_dot = functools.partial(jnp.dot, precision=lax.Precision.HIGHEST,
                         preferred_element_type=jnp.float32)


def _vmem_spec():
    return pl.BlockSpec(memory_space=pltpu.MemorySpace.VMEM)


# --------------------------------------------------------------------------
# Kernel 1: fused mask production + threshold + concentration matrix
#   w            = sigmoid(cluster_attention)
#   combined     = cluster_masks^T @ w                      (per node, column)
#   binary_mask  = combined > mean(combined)
#   C            = diag(sqrt(lam_K)) (U_K^T S U_K) diag(sqrt(lam_K))
# computed as (U_K*sqrt(lam))^T masked matmul so only row/column-vector
# broadcasts and one in-kernel transpose are needed.
# --------------------------------------------------------------------------
def _c_kernel(uk_ref, attn_ref, cmt_ref, ev_ref, c_ref):
    # attn_ref: (1, C)  cmt_ref: (N, C)  ev_ref: (1, K)  uk_ref: (N, K)
    w = 1.0 / (1.0 + jnp.exp(-attn_ref[...]))                     # (1, C)  EUP
    cm = jnp.sum(cmt_ref[...] * w, axis=1, keepdims=True)         # (N, 1)
    thr = jnp.sum(cm, axis=0, keepdims=True) * (1.0 / cm.shape[0])  # (1, 1) mean
    bmask = jnp.where(cm > thr, 1.0, 0.0)                         # (N, 1)
    # clamp: f32 eigh can push the ~1e-5 smallest eigenvalue slightly negative
    sl = jnp.sqrt(jnp.maximum(ev_ref[...], 0.0))                  # (1, K)  EUP
    uks = uk_ref[...] * sl                                        # (N, K)
    # C[a,b] = sum_n bmask[n] * uks[n,a] * uks[n,b]
    c_ref[...] = _dot((uks * bmask).T, uks)                       # (K, K)  MXU


def concentration_matrix(U_K, cluster_attention_row, cluster_masks_t, eigvals_K):
    N, K = U_K.shape
    return pl.pallas_call(
        _c_kernel,
        out_shape=jax.ShapeDtypeStruct((K, K), jnp.float32),
        in_specs=[_vmem_spec()] * 4,
        out_specs=_vmem_spec(),
    )(U_K, cluster_attention_row, cluster_masks_t, eigvals_K.reshape(1, K))


# --------------------------------------------------------------------------
# Kernel 2: Slepian projection + 3-layer per-slepian filter + back-projection,
# all in a lane-dense flattened (k*Hd + h) layout.
# --------------------------------------------------------------------------
def _slepnet_kernel(uk_ref, ss_ref, h_ref, w1_ref, w2_ref, w3_ref, out_ref):
    k = ss_ref.shape[0]
    kh = w1_ref.shape[1]
    hd = kh // k

    s_k = _dot(uk_ref[...], ss_ref[...])                          # (N, K)   MXU

    # Expansion matrix E[k, k*Hd + h] = 1, built from iota (no extra DMA).
    row = lax.broadcasted_iota(jnp.int32, (k, kh), 0)
    col = lax.broadcasted_iota(jnp.int32, (k, kh), 1)
    expand = jnp.where(row == col // hd, 1.0, 0.0)                # (K, K*Hd)

    # s_k_exp[n, k*Hd+h] = s_k[n, k]  (each column replicated Hd times)
    s_k_exp = _dot(s_k, expand)                                   # (N, K*Hd) MXU
    # h_slep_exp[i, k*Hd+h] = H_slep[k, i] = sum_n H[n,i] s_k[n,k]
    h_slep_exp = _dot(h_ref[...].T, s_k_exp)                      # (Cin, K*Hd) MXU

    # layer 1: relu(einsum('kic,ki->kc')) in flattened layout (VPU + sublane reduce)
    h1 = jnp.maximum(jnp.sum(w1_ref[...] * h_slep_exp, axis=0, keepdims=True), 0.0)
    # layer 2: einsum('kch,kc->kc') == (sum_h W2) * h1 (pre-reduced at init)
    h2 = jnp.maximum(w2_ref[...] * h1, 0.0)                       # (1, K*Hd)

    # layer 3 + back-projection fused into one MXU contraction:
    #   out[n,o] = sum_{k,h} s_k[n,k] * h2[k,h] * W3[k,h,o]
    # TODO(synk): Cout=6 output is <128 lanes (masked vst); fine at this toy
    # size but should be re-laid lane-dense if shapes grow.
    out_ref[...] = _dot(s_k_exp * h2, w3_ref[...])                # (N, Cout)


def slepnet(U_K, s_small, H, W1_flat, W2_flat, W3_flat):
    N, _ = U_K.shape
    Cout = W3_flat.shape[1]
    return pl.pallas_call(
        _slepnet_kernel,
        out_shape=jax.ShapeDtypeStruct((N, Cout), jnp.float32),
        in_specs=[_vmem_spec()] * 6,
        out_specs=_vmem_spec(),
    )(U_K, s_small, H, W1_flat, W2_flat, W3_flat)


# --------------------------------------------------------------------------
# One-time parameter / buffer re-layouts (hoisted out of forward per review).
# --------------------------------------------------------------------------
def prepare_params(params, cluster_masks):
    K, Cin, Hd = params["W1"].shape
    Cout = params["W3"].shape[2]
    return {
        # (1, C) row so the kernel does a lane-wise blend without a transpose
        "cluster_attention_row": params["cluster_attention"].reshape(1, -1),
        "cluster_masks_t": jnp.transpose(cluster_masks),            # (N, C)
        # W1_flat[i, k*Hd+h] = W1[k, i, h]
        "W1_flat": jnp.transpose(params["W1"], (1, 0, 2)).reshape(Cin, K * Hd),
        # W2_flat[0, k*Hd+c] = sum_h W2[k, c, h]
        "W2_flat": jnp.sum(params["W2"], axis=2).reshape(1, K * Hd),
        # W3_flat[k*Hd+h, o] = W3[k, h, o]
        "W3_flat": params["W3"].reshape(K * Hd, Cout),
    }


# --------------------------------------------------------------------------
# Forward pass (glue in plain JAX, hot paths in Pallas)
# --------------------------------------------------------------------------
def forward(H, edge_index, prep):
    N, K = NUM_NODES, NUM_SLEPIANS

    # to_dense_adj(edge_index)[0] -> scatter-add of edges (kept in XLA).
    adj = jnp.zeros((N, N), jnp.float32).at[edge_index[0], edge_index[1]].add(1.0)

    # ---- compute_slepian_basis ----
    L = jnp.diag(jnp.sum(adj, axis=1)) - adj + 1e-5 * jnp.eye(N, dtype=jnp.float32)
    # TODO(synk): eigh has no Pallas equivalent; kept in XLA.
    eigvals, U = jnp.linalg.eigh(L)
    U_K = U[:, :K].astype(jnp.float32)                           # = U @ W
    eigvals_K = eigvals[:K].astype(jnp.float32)

    # Sigmoid, mask blend, threshold, binary mask and sqrt(Lambda_W) are all
    # fused inside the kernel (no standalone XLA ops, no combined_mask HBM trip).
    C = concentration_matrix(U_K, prep["cluster_attention_row"],
                             prep["cluster_masks_t"], eigvals_K)
    _, s = jnp.linalg.eigh(C)                                    # XLA eigh
    s_small = s[:, :K].astype(jnp.float32)                       # (K, K)

    H_out = slepnet(U_K, s_small, H,
                    prep["W1_flat"], prep["W2_flat"], prep["W3_flat"])
    aux = dict(U_K=U_K, s_small=s_small, eigvals_K=eigvals_K, C=C)
    return H_out, aux


# --------------------------------------------------------------------------
# Pure-JAX references for the two kernels (same inputs -> same math)
# --------------------------------------------------------------------------
def _ref_c(U_K, cluster_attention, cluster_masks, eigvals_K):
    hp = lax.Precision.HIGHEST
    w = jax.nn.sigmoid(cluster_attention)                              # (C, 1)
    cm = jnp.matmul(w.T, cluster_masks, precision=hp).reshape(-1)      # (N,)
    thr = cm.mean()
    bmask = (cm > thr).astype(jnp.float32)
    sl = jnp.sqrt(jnp.maximum(eigvals_K, 0.0))
    m = jnp.matmul(U_K.T, bmask[:, None] * U_K, precision=hp)
    return sl[:, None] * m * sl[None, :]


def _ref_slepnet(U_K, s_small, H, W1, W2, W3):
    hp = lax.Precision.HIGHEST
    s_k = jnp.matmul(U_K, s_small, precision=hp)
    h_slep = jnp.matmul(s_k.T, H, precision=hp)
    h1 = jax.nn.relu(jnp.einsum("kic,ki->kc", W1, h_slep, precision=hp))
    h2 = jax.nn.relu(jnp.einsum("kch,kc->kc", W2, h1, precision=hp))
    hf = jnp.einsum("kho,kh->ko", W3, h2, precision=hp)
    return jnp.matmul(s_k, hf, precision=hp)


if __name__ == "__main__":
    key = jax.random.PRNGKey(0)
    k1, k2, k3, k4, k5, k6 = jax.random.split(key, 6)

    params = {
        "W1": jax.random.normal(k1, (NUM_SLEPIANS, IN_CHANNELS, HIDDEN_DIM), jnp.float32),
        "W2": jax.random.normal(k2, (NUM_SLEPIANS, HIDDEN_DIM, HIDDEN_DIM), jnp.float32),
        "W3": jax.random.normal(k3, (NUM_SLEPIANS, HIDDEN_DIM, OUT_CHANNELS), jnp.float32),
        "cluster_attention": jax.random.normal(k4, (NUM_CLUSTERS, 1), jnp.float32),
    }
    cluster_masks = jax.random.uniform(k5, (NUM_CLUSTERS, NUM_NODES), jnp.float32)
    H = jax.random.normal(k6, (NUM_NODES, IN_CHANNELS), jnp.float32)

    # Symmetric edge set (ring + step-3 chords, both directions) so the
    # Laplacian is symmetric, matching torch.linalg.eigh semantics.
    src, dst = [], []
    for i in range(NUM_NODES):
        for j in (1, 3):
            a, b = i, (i + j) % NUM_NODES
            src += [a, b]
            dst += [b, a]
    edge_index = jnp.array([src, dst], dtype=jnp.int32)

    # Weight / buffer re-layouts happen once, at parameter-init time.
    prep = prepare_params(params, cluster_masks)

    H_out, aux = forward(H, edge_index, prep)
    H_out = jax.block_until_ready(H_out)

    # Sanity-check the Pallas kernels against pure-JAX references on the
    # exact same inputs (eigh outputs shared, so no sign/order ambiguity).
    C_ref = _ref_c(aux["U_K"], params["cluster_attention"], cluster_masks,
                   aux["eigvals_K"])
    out_ref = _ref_slepnet(aux["U_K"], aux["s_small"], H,
                           params["W1"], params["W2"], params["W3"])
    np.testing.assert_allclose(np.asarray(aux["C"]), np.asarray(C_ref),
                               rtol=2e-3, atol=2e-3)
    np.testing.assert_allclose(np.asarray(H_out), np.asarray(out_ref),
                               rtol=2e-3, atol=1e-2)
    assert H_out.shape == (NUM_NODES, OUT_CHANNELS)

    print("KERNEL_OK")
</pallas_src>

<mosaic_0001>
module attributes {stable_mosaic.version = 11 : i64} {
  func.func @_c_kernel(%arg0: memref<16x8xf32, #tpu.memory_space<vmem>>, %arg1: memref<1x4xf32, #tpu.memory_space<vmem>>, %arg2: memref<16x4xf32, #tpu.memory_space<vmem>>, %arg3: memref<1x8xf32, #tpu.memory_space<vmem>>, %arg4: memref<8x8xf32, #tpu.memory_space<vmem>>) attributes {dimension_semantics = [], scalar_prefetch = 0 : i64, scratch_operands = 0 : i64, tpu.core_type = #tpu.core_type<tc>} {
    %c0 = arith.constant 0 : index
    %c0_0 = arith.constant 0 : index
    %0 = vector.load %arg1[%c0, %c0_0] : memref<1x4xf32, #tpu.memory_space<vmem>>, vector<1x4xf32>
    %cst = arith.constant 0.000000e+00 : f32
    %1 = vector.broadcast %cst : f32 to vector<1x4xf32>
    %2 = arith.subf %1, %0 : vector<1x4xf32>
    %3 = math.exp %2 : vector<1x4xf32>
    %cst_1 = arith.constant 1.000000e+00 : f32
    %4 = vector.broadcast %cst_1 : f32 to vector<1x4xf32>
    %5 = arith.addf %4, %3 : vector<1x4xf32>
    %cst_2 = arith.constant 1.000000e+00 : f32
    %6 = vector.broadcast %cst_2 : f32 to vector<1x4xf32>
    %7 = arith.divf %6, %5 : vector<1x4xf32>
    %c0_3 = arith.constant 0 : index
    %c0_4 = arith.constant 0 : index
    %8 = vector.load %arg2[%c0_3, %c0_4] : memref<16x4xf32, #tpu.memory_space<vmem>>, vector<16x4xf32>
    %9 = vector.broadcast %7 : vector<1x4xf32> to vector<16x4xf32>
    %10 = arith.mulf %8, %9 : vector<16x4xf32>
    %cst_5 = arith.constant dense<0.000000e+00> : vector<16xf32>
    %11 = vector.multi_reduction <add>, %10, %cst_5 [1] : vector<16x4xf32> to vector<16xf32>
    %12 = vector.shape_cast %11 : vector<16xf32> to vector<16x1xf32>
    %cst_6 = arith.constant dense<0.000000e+00> : vector<1xf32>
    %13 = vector.multi_reduction <add>, %12, %cst_6 [0] : vector<16x1xf32> to vector<1xf32>
    %14 = vector.shape_cast %13 : vector<1xf32> to vector<1x1xf32>
    %cst_7 = arith.constant 6.250000e-02 : f32
    %15 = vector.broadcast %cst_7 : f32 to vector<1x1xf32>
    %16 = arith.mulf %14, %15 : vector<1x1xf32>
    %17 = vector.broadcast %16 : vector<1x1xf32> to vector<16x1xf32>
    %18 = arith.cmpf ogt, %12, %17 : vector<16x1xf32>
    %cst_8 = arith.constant 1.000000e+00 : f32
    %cst_9 = arith.constant 0.000000e+00 : f32
    %19 = vector.broadcast %cst_8 : f32 to vector<16x1xf32>
    %20 = vector.broadcast %cst_9 : f32 to vector<16x1xf32>
    %21 = arith.select %18, %19, %20 : vector<16x1xi1>, vector<16x1xf32>
    %c0_10 = arith.constant 0 : index
    %c0_11 = arith.constant 0 : index
    %22 = vector.load %arg3[%c0_10, %c0_11] : memref<1x8xf32, #tpu.memory_space<vmem>>, vector<1x8xf32>
    %cst_12 = arith.constant 0.000000e+00 : f32
    %23 = vector.broadcast %cst_12 : f32 to vector<1x8xf32>
    %24 = arith.maximumf %22, %23 : vector<1x8xf32>
    %25 = math.sqrt %24 : vector<1x8xf32>
    %c0_13 = arith.constant 0 : index
    %c0_14 = arith.constant 0 : index
    %26 = vector.load %arg0[%c0_13, %c0_14] : memref<16x8xf32, #tpu.memory_space<vmem>>, vector<16x8xf32>
    %27 = vector.broadcast %25 : vector<1x8xf32> to vector<16x8xf32>
    %28 = arith.mulf %26, %27 : vector<16x8xf32>
    %29 = vector.broadcast %21 : vector<16x1xf32> to vector<16x8xf32>
    %30 = arith.mulf %28, %29 : vector<16x8xf32>
    %31 = tpu.transpose %30, [1, 0] : vector<16x8xf32> -> vector<8x16xf32>
    %cst_15 = arith.constant dense<0.000000e+00> : vector<8x8xf32>
    %32 = tpu.matmul %31, %28, %cst_15 {dimension_numbers = #tpu.dot_dimension_numbers<[1], [0], [0], [1], [0, 0, 1, 1], [], []>, precision = #tpu.contract_precision<fp32>} : vector<8x16xf32>, vector<16x8xf32>, vector<8x8xf32> -> vector<8x8xf32>
    %c0_16 = arith.constant 0 : index
    %c0_17 = arith.constant 0 : index
    %33 = vector.load %arg4[%c0_16, %c0_17] : memref<8x8xf32, #tpu.memory_space<vmem>>, vector<8x8xf32>
    tpu.vector_store %arg4[%c0_16, %c0_17], %32 {strides = array<i32>} : memref<8x8xf32, #tpu.memory_space<vmem>>, vector<8x8xf32>,
    return
  }
}

</mosaic_0001>

<bundles_post_ra>
// kernel: tpu_custom_call.1
= control target key start
LH: loop header
LB: loop body
LE: loop exit
PB: predicated region body
PF: predicated region fallthrough
CT: control target
= control target key end

     0   :  { %s772_s0 = inlined_call_operand.vmem [shape: f32[16,8], index: 0, kind: input, shape index: {}]   ;;  %s773_s1 = inlined_call_operand.vmem [shape: f32[1,4], index: 1, kind: input, shape index: {}]   ;;  %s774_s2 = inlined_call_operand.vmem [shape: f32[16,4], index: 2, kind: input, shape index: {}]   ;;  %s775_s3 = inlined_call_operand.vmem [shape: f32[1,8], index: 3, kind: input, shape index: {}]   ;;  %s776_s4 = inlined_call_operand.hbm [shape: f32[8,8], index: 4, kind: output, shape index: {}]  }
   0x1   :  { %v18_v0 = vld [vmem:[%s773_s1] sm:$0x1] }
   0x2   :  { %v19_v1 = vsub.f32 0.0, %v18_v0 }
   0x3   :  { %9 = vsyncpa [#allocation3], 0  ;;  %v28_v5 = vlaneseq  ;;  %v25_v9 = vld [vmem:[%s774_s2] sm:$0xff]  ;;  %v26_v10 = vld [vmem:[%s774_s2 + $0x8] sm:$0xff]  ;;  %vm35_vm0 = vcmask 31744   ;;  %v707_v37 = vmov 0.0  }
   0x4   :  { %v20_v2 = vmul.f32 1.442695, %v19_v1  ;;  %v54_v16 = vld [vmem:[%s775_s3] sm:$0x1]  ;;  %v64_v36 = vld [vmem:[%s772_s0 + $0x8] sm:$0xff]  ;;  %v708_v46 = vmov 0.0|0.0  }
   0x5   :  { %v29_v6 = vshrl.u32 %v28_v5, 7  ;;  %v55_v17 = vmax.f32 %v54_v16, 0.0  ;;  %v63_v32 = vld [vmem:[%s772_s0] sm:$0xff]  ;;  %655 = vmatprep.subr.bf16.mxu0 %v708_v46  ;;  %646 = vmatprep.subr.bf16.mxu1 %v708_v46  ;;  %vm709_vm5 = vmmov 0   ;;  %vm107_vm6 = vcmask 130048   ;;  %s710_s0 = smov [#allocation2]  }
   0x6   :  { %677 = vpow2.f32 %v20_v2  ;;  %629 = vmatprep.mubr.msk.f32.mxu0 %vm709_vm5, %v707_v37  ;;  %608 = vmatprep.mubr.msk.f32.mxu1 %vm709_vm5, %v707_v37  ;;  %s578_s24 = sshll.u32 %s710_s0, 4  ;;  %vm570_vm7 = vcmask 64512   ;;  %s579_s24 = int_to_ptr.vmem [resolvable:$true] %s578_s24 }
   0x7   :  { %v30_v7 = vsub.s32 0, %v29_v6  ;;  %vm58_vm1 = vcmp.eq.f32.partialorder %v55_v17, inf  ;;  %v61_v24 = vand.u32 2147483648, %v55_v17  ;;  %vm60_vm2 = vcmp.eq.f32.partialorder %v55_v17, 0.0  ;;  %s683_s25 = scalar_lea.vmem %s579_s24, 128  ;;  %p688_p1 = scmp.lt.s32.totalorder %s579_s24, %s579_s24 }
   0x8   :  { %p684_p0 = scmp.ne.s32.totalorder %s579_s24, %s683_s25  ;;  %p689_p2 = scmp.lt.s32.totalorder %s683_s25, %s683_s25 }
   0xa   :  { %p690_p3 = por %p689_p2, %p688_p1 }
   0xc   :  { %p691_p4 = pnand %p690_p3, %p684_p0 }
  0x10   :  { %v678_v3 = vpop.eup %677 }
  0x11   :  { %v22_v4 = vadd.f32 1.0, %v678_v3 }
  0x13   :  { %679 = vrcp.f32 %v22_v4 }
  0x14   :  { %681 = vrsqrt.f32 %v55_v17 }
  0x1d   :  { %v680_v8 = vpop.eup %679 }
  0x1e   :  { %v31_v11 = vrot.slane %v680_v8, %v30_v7  ;;  %v682_v19 = vpop.eup %681 }
  0x1f   :  { %v57_v22 = vmul.f32 %v682_v19, %v55_v17 }
  0x20   :  { %v33_v12 = vmul.f32 %v31_v11, %v25_v9  ;;  %v34_v13 = vmul.f32 %v31_v11, %v26_v10 }
  0x21   :  { %v59_v26 = vsel %vm58_vm1, %v55_v17, %v57_v22 }
  0x22   :  { %v36_v14 = vsel %vm35_vm0, %v33_v12, 0.0  ;;  %v39_v15 = vsel %vm35_vm0, %v34_v13, 0.0  ;;  %v62_v28 = vsel %vm60_vm2, %v61_v24, %v59_v26 }
  0x23   :  { %37 = vadd.xlane.f32.xlu0 %v36_v14  ;;  %v69_v31 = vrot.slane %v62_v28, %v30_v7 }
  0x25   :  { %v71_v35 = vmul.f32 %v69_v31, %v63_v32  ;;  %v72_v40 = vmul.f32 %v69_v31, %v64_v36 }
  0x27   :  { %40 = vadd.xlane.f32.xlu0 %v39_v15  ;;  %v112_v42 = vand.u32 4294901760, %v71_v35  ;;  %v115_v43 = vand.u32 4294901760, %v72_v40 }
  0x29   :  { %v647_v45 = vpack.c.bf16 %v115_v43, %v112_v42  ;;  %v190_v47 = vsub.f32 %v71_v35, %v112_v42  ;;  %v197_v48 = vsub.f32 %v72_v40, %v115_v43 }
  0x2b   :  { %657 = vmatpush3.bf16.msra.mxu0 %v647_v45  ;;  %648 = vmatpush3.bf16.msra.mxu1 %v647_v45  ;;  %v191_v49 = vand.u32 4294901760, %v190_v47  ;;  %v198_v50 = vand.u32 4294901760, %v197_v48  ;;  %v653_v57 = vpack.c.bf16 %v197_v48, %v190_v47 }
  0x2c   :  { %649 = vmatprep.subr.bf16.mxu1 %v708_v46  ;;  %658 = vmatprep.subr.bf16.mxu0 %v708_v46 }
  0x2d   :  { %v192_v51 = vsub.f32 %v190_v47, %v191_v49  ;;  %v199_v52 = vsub.f32 %v197_v48, %v198_v50  ;;  %v659_v53 = vpack.c.bf16 %v198_v50, %v191_v49 }
  0x2f   :  { %v193_v54 = vand.u32 4294901760, %v192_v51  ;;  %v200_v55 = vand.u32 4294901760, %v199_v52 }
  0x31   :  { %v650_v56 = vpack.c.bf16 %v200_v55, %v193_v54 }
  0xb0   :  { %v38_v18 = vpop.xlane.xlu0 %37 }
  0xb4   :  { %v41_v20 = vpop.xlane.xlu0 %40 }
  0xb5   :  { %v42_v21 = vadd.f32 %v41_v20, %v38_v18 }
  0xb7   :  { %v43_v23 = vrot.slane %v42_v21, 4 }
  0xb9   :  { %v44_v25 = vadd.f32 %v43_v23, %v42_v21 }
  0xbb   :  { %v45_v27 = vrot.slane %v44_v25, 2 }
  0xbd   :  { %v46_v29 = vadd.f32 %v45_v27, %v44_v25 }
  0xbf   :  { %v47_v30 = vrot.slane %v46_v29, 1 }
  0xc1   :  { %v48_v33 = vadd.f32 %v47_v30, %v46_v29 }
  0xc3   :  { %v49_v34 = vmul.f32 0.0625, %v48_v33 }
  0xc5   :  { %vm51_vm3 = vcmp.gt.f32.partialorder %v41_v20, %v49_v34  ;;  %vm50_vm4 = vcmp.gt.f32.partialorder %v38_v18, %v49_v34 }
  0xc6   :  { %v52_v38 = vsel %vm50_vm4, 1.0, %v707_v37  ;;  %v53_v41 = vsel %vm51_vm3, 1.0, %v707_v37 }
  0xc7   :  { %v73_v39 = vmul.f32 %v71_v35, %v52_v38  ;;  %v74_v44 = vmul.f32 %v72_v40, %v53_v41 }
  0xc9   :  { %75 = vxpose.xlu1.b32.start [1/2] (short) (narrow) %v73_v39, 8 }
  0xcd   :  { %76 = vxpose.xlu1.b32.end [2/2] (short) (narrow) %v74_v44, 8 }
 0x149   :  { %v91_v58 = vpop.trf.xlu1 }
 0x14a   :  { %v109_v59 = vsel %vm107_vm6, %v91_v58, 0 }
 0x14b   :  { %v178_v60 = vand.u32 4294901760, %v109_v59 }
 0x14d   :  { %v179_v61 = vsub.f32 %v109_v59, %v178_v60 }
 0x14f   :  { %v180_v62 = vand.u32 4294901760, %v179_v61 }
 0x151   :  { %630 = vmatmul.mubr.f32.vlgmr.msra.gmra.mrb[0].mxu0 %v180_v62  ;;  %v181_v63 = vsub.f32 %v179_v61, %v180_v62 }
 0x152   :  { %660 = vmatpush3.bf16.msra.mxu0 %v659_v53  ;;  %636 = vmatprep.mubr.msk.f32.mxu0 %vm709_vm5, %v707_v37 }
 0x153   :  { %v182_v0 = vand.u32 4294901760, %v181_v63  ;;  %661 = vmatprep.subr.bf16.mxu0 %v708_v46 }
 0x155   :  { %609 = vmatmul.mubr.f32.vlgmr.msra.gmra.mrb[0].mxu1 %v182_v0 }
 0x156   :  { %651 = vmatpush3.bf16.msra.mxu1 %v650_v56  ;;  %615 = vmatprep.mubr.msk.f32.mxu1 %vm709_vm5, %v707_v37 }
 0x157   :  { %652 = vmatprep.subr.bf16.mxu1 %v708_v46 }
 0x159   :  { %637 = vmatmul.mubr.f32.vlgmr.msra.gmra.mrb[0].mxu0 %v178_v60 }
 0x15a   :  { %663 = vmatpush3.bf16.msra.mxu0 %v647_v45  ;;  %643 = vmatprep.mubr.msk.f32.mxu0 %vm709_vm5, %v707_v37 }
 0x15d   :  { %616 = vmatmul.mubr.f32.vlgmr.msra.gmra.mrb[0].mxu1 %v178_v60 }
 0x15e   :  { %654 = vmatpush3.bf16.msra.mxu1 %v653_v57  ;;  %622 = vmatprep.mubr.msk.f32.mxu1 %vm709_vm5, %v707_v37 }
 0x161   :  { %644 = vmatmul.mubr.f32.vlgmr.msra.gmra.mrb[0].mxu0 %v178_v60 }
 0x165   :  { %623 = vmatmul.mubr.f32.vlgmr.msra.gmra.mrb[0].mxu1 %v179_v61 }
 0x234   :  { %v566_v1 = vpop.f32.mrb[0].mxu0 }
 0x235   :  { %v645_v2 = vpop.f32.mrb[1].mxu0 }
 0x238   :  { %v341_v3 = vpop.f32.mrb[0].mxu1 }
 0x239   :  { %v664_v4 = vadd.f32 %v566_v1, %v341_v3  ;;  %v624_v5 = vpop.f32.mrb[1].mxu1 }
 0x23b   :  { %571 = vst.msk [vmem:[#allocation2] sm:$0xff] %vm570_vm7, %v664_v4 }
 0x23c   :  { %694 = shalt.err (!%p691_p4)
}
 0x23d   :  { %s695_s28 = scalar_lea.hbm %s776_s4, 128 }
 0x23e   :  { %p696_p5 = scmp.ne.s32.totalorder %s776_s4, %s695_s28  ;;  %p699_p6 = scmp.lt.u32.totalorder %s695_s28, %s776_s4 }
 0x240   :  { %p701_p7 = pnand %p699_p6, %p696_p5 }
 0x242   :  { %704 = shalt.err (!%p701_p7)
}
 0x243   :  { %581 = dma.vmem_to_hbm [thread:$0]  %s579_s24, 128, %s776_s4, [#allocation3]  }
 0x244   :  { %705 = dma.done.wait [#allocation3], 128  }
 0x245   :  { %706 = vsyncadd [#allocation3], 4294967168 }
 0x246   :  { %585 = vsyncpa [#allocation3], 1 }

</bundles_post_ra>
